<compile_context>
chip_gen: v5e
topology: v5e:2x2
jax: 0.10.0
libtpu: 0.0.40
codegen_flags: <defaults>
</compile_context>

<pallas_src>
import math

import jax
import jax.numpy as jnp
from jax.experimental import pallas as pl
from jax.experimental.pallas import tpu as pltpu


# ---------------------------------------------------------------------------
# Kernel
# ---------------------------------------------------------------------------
def a2c_kernel(xx_ref, wfb_ref, w1_ref, w2_ref, bias_ref, out_ref):
    """Fused forward pass: 3 lane-dense MXU matmuls, one unmasked output store.

    bias_ref lane layout (128-aligned slots, pre-broadcast over the batch):
      [  0:128) = [bf | bf]               feature bias for state and state_prev
      [128:256) = [bp1 | bc1 | bim1 | 0]  first-layer head biases (96 used)
      [256:   ) = [bp2 | bc2 | bim2 | 0]  second-layer biases, lane-dense padded
    """
    # (1) shared feature trunk for BOTH states via a block-diagonal weight:
    #     [state | state_prev] @ blockdiag(Wf, Wf) -> [f | f_prev]  (B, 128)
    ff = jnp.maximum(
        jnp.dot(xx_ref[...], wfb_ref[...], preferred_element_type=jnp.float32)
        + bias_ref[:, 0:128],
        0.0)

    # (2) all three first-layer head hiddens in one matmul:
    #     columns [0:32)=policy (rows 64:128 zero), [32:64)=critic (rows 64:128
    #     zero), [64:96)=inverse model (full 128 rows = concat(f, f_prev)).
    n_h1 = w1_ref.shape[1]  # 96
    h = jnp.maximum(
        jnp.dot(ff, w1_ref[...], preferred_element_type=jnp.float32)
        + bias_ref[:, 128:128 + n_h1],
        0.0)

    # (3) block-diagonal second layer -> packed, lane-dense output
    #     [policy | critic | im | zero-pad]  (B, out_pad), single unmasked store.
    out_ref[...] = (
        jnp.dot(h, w2_ref[...], preferred_element_type=jnp.float32)
        + bias_ref[:, 256:])


# ---------------------------------------------------------------------------
# Parameter construction (PyTorch-equivalent raw params) and host-side packing
# ---------------------------------------------------------------------------
def init_params(key, input_dim, outputs_count, features_count=64):
    """Raw parameters, stored as (in_features, out_features) [transposed vs torch].

    Feature-layer weight uses xavier-uniform (as in Model.__init__); all other
    weights/biases use the nn.Linear default uniform(-1/sqrt(fan_in), +).
    """
    keys = iter(jax.random.split(key, 16))

    def xavier(shape):
        fan_in, fan_out = shape
        bound = math.sqrt(6.0 / (fan_in + fan_out))
        return jax.random.uniform(next(keys), shape, jnp.float32, -bound, bound)

    def default_w(shape):
        bound = 1.0 / math.sqrt(shape[0])
        return jax.random.uniform(next(keys), shape, jnp.float32, -bound, bound)

    def default_b(fan_in, n):
        bound = 1.0 / math.sqrt(fan_in)
        return jax.random.uniform(next(keys), (n,), jnp.float32, -bound, bound)

    p = {}
    p["wf"] = xavier((input_dim, features_count))
    p["bf"] = default_b(input_dim, features_count)
    p["wp1"] = default_w((features_count, 32))
    p["bp1"] = default_b(features_count, 32)
    p["wp2"] = default_w((32, outputs_count))
    p["bp2"] = default_b(32, outputs_count)
    p["wc1"] = default_w((features_count, 32))
    p["bc1"] = default_b(features_count, 32)
    p["wc2"] = default_w((32, 1))
    p["bc2"] = default_b(32, 1)
    p["wim1"] = default_w((2 * features_count, 32))
    p["bim1"] = default_b(2 * features_count, 32)
    p["wim2"] = default_w((32, outputs_count))
    p["bim2"] = default_b(32, outputs_count)
    return p


def pack_params(p, input_dim, outputs_count, features_count=64):
    """Fuse the 15 parameter tensors into 4 kernel operands (host-side, one-off)."""
    F, H, D = features_count, 32, input_dim
    assert 2 * F == 128, "packing assumes features_count == 64 (as in the module)"
    no2 = 2 * outputs_count + 1
    out_pad = ((no2 + 127) // 128) * 128  # lane-dense output width

    # block-diagonal feature weight: [state | state_prev] @ wfb -> [f | f_prev]
    wfb = jnp.zeros((2 * D, 2 * F), jnp.float32)
    wfb = wfb.at[:D, :F].set(p["wf"])
    wfb = wfb.at[D:, F:].set(p["wf"])

    # fused first-layer head weight (policy/critic rows 64:128 are zero)
    w1 = jnp.zeros((2 * F, 3 * H), jnp.float32)
    w1 = w1.at[:F, 0:H].set(p["wp1"])
    w1 = w1.at[:F, H:2 * H].set(p["wc1"])
    w1 = w1.at[:, 2 * H:3 * H].set(p["wim1"])

    # block-diagonal second-layer weight, zero-padded to a lane-dense output
    w2 = jnp.zeros((3 * H, out_pad), jnp.float32)
    w2 = w2.at[0:H, 0:outputs_count].set(p["wp2"])
    w2 = w2.at[H:2 * H, outputs_count:outputs_count + 1].set(p["wc2"])
    w2 = w2.at[2 * H:3 * H, outputs_count + 1:no2].set(p["wim2"])

    # all biases packed into one array with 128-lane-aligned slots
    bias = jnp.zeros((1, 256 + out_pad), jnp.float32)
    bias = bias.at[0, 0:F].set(p["bf"])
    bias = bias.at[0, F:2 * F].set(p["bf"])
    bias = bias.at[0, 128:128 + H].set(p["bp1"])
    bias = bias.at[0, 128 + H:128 + 2 * H].set(p["bc1"])
    bias = bias.at[0, 128 + 2 * H:128 + 3 * H].set(p["bim1"])
    bias = bias.at[0, 256:256 + outputs_count].set(p["bp2"])
    bias = bias.at[0, 256 + outputs_count].set(p["bc2"][0])
    bias = bias.at[0, 256 + outputs_count + 1:256 + no2].set(p["bim2"])

    return {"wfb": wfb, "w1": w1, "w2": w2, "bias": bias}


# ---------------------------------------------------------------------------
# Forward wrapper
# ---------------------------------------------------------------------------
def a2c_forward(state, state_prev, packed, outputs_count, *, batch_block=512):
    B = state.shape[0]
    wfb, w1, w2, bias = packed["wfb"], packed["w1"], packed["w2"], packed["bias"]
    out_pad = w2.shape[1]
    no2 = 2 * outputs_count + 1

    # lane-adjacent stacking: one feature matmul covers both states
    xx = jnp.concatenate([state, state_prev], axis=1)  # (B, 2*input_dim)

    use_grid = (B > batch_block) and (B % batch_block == 0)
    if use_grid:
        # Large-batch path: 1-D 'parallel' grid over batch so both TensorCores
        # (v7x megacore) get work; weights/bias blocks are constant per step.
        tb = batch_block
        bias_b = jnp.broadcast_to(bias, (tb, bias.shape[1]))
        grid_spec = pltpu.PrefetchScalarGridSpec(
            num_scalar_prefetch=0,
            grid=(B // tb,),
            in_specs=[
                pl.BlockSpec((tb, xx.shape[1]), lambda i: (i, 0)),
                pl.BlockSpec(wfb.shape, lambda i: (0, 0)),
                pl.BlockSpec(w1.shape, lambda i: (0, 0)),
                pl.BlockSpec(w2.shape, lambda i: (0, 0)),
                pl.BlockSpec(bias_b.shape, lambda i: (0, 0)),
            ],
            out_specs=pl.BlockSpec((tb, out_pad), lambda i: (i, 0)),
        )
        out = pl.pallas_call(
            a2c_kernel,
            out_shape=jax.ShapeDtypeStruct((B, out_pad), jnp.float32),
            grid_spec=grid_spec,
            compiler_params=pltpu.CompilerParams(
                dimension_semantics=("parallel",)),
        )(xx, wfb, w1, w2, bias_b)
    else:
        # Small-batch path: everything fits comfortably in VMEM as one block.
        bias_b = jnp.broadcast_to(bias, (B, bias.shape[1]))
        vmem = pl.BlockSpec(memory_space=pltpu.MemorySpace.VMEM)
        out = pl.pallas_call(
            a2c_kernel,
            out_shape=jax.ShapeDtypeStruct((B, out_pad), jnp.float32),
            in_specs=[vmem] * 5,
            out_specs=vmem,
        )(xx, wfb, w1, w2, bias_b)

    # unpack the lane-dense output [policy | critic | im | zero-pad]
    policy = out[:, :outputs_count]
    critic = out[:, outputs_count:outputs_count + 1]
    im = out[:, outputs_count + 1:no2]
    return policy, critic, im


# ---------------------------------------------------------------------------
# Pure-JAX reference (unfused, raw params) for correctness checking
# ---------------------------------------------------------------------------
def reference_forward(state, state_prev, p):
    relu = lambda v: jnp.maximum(v, 0.0)
    f = relu(state @ p["wf"] + p["bf"])
    fp = relu(state_prev @ p["wf"] + p["bf"])
    pol = relu(f @ p["wp1"] + p["bp1"]) @ p["wp2"] + p["bp2"]
    cri = relu(f @ p["wc1"] + p["bc1"]) @ p["wc2"] + p["bc2"]
    im_in = jnp.concatenate([f, fp], axis=1)
    im = relu(im_in @ p["wim1"] + p["bim1"]) @ p["wim2"] + p["bim2"]
    return pol, cri, im


if __name__ == "__main__":
    # LunarLander-like: 8-dim observation, 4 actions.
    input_dim = 8
    outputs_count = 4
    batch = 8

    key = jax.random.PRNGKey(0)
    k_params, k_state, k_prev = jax.random.split(key, 3)

    raw = init_params(k_params, input_dim, outputs_count)
    packed = pack_params(raw, input_dim, outputs_count)

    state = jax.random.normal(k_state, (batch, input_dim), jnp.float32)
    state_prev = jax.random.normal(k_prev, (batch, input_dim), jnp.float32)

    policy, critic, im = jax.block_until_ready(
        a2c_forward(state, state_prev, packed, outputs_count))

    # correctness check against the pure-JAX (unfused) reference
    ref_policy, ref_critic, ref_im = reference_forward(state, state_prev, raw)
    assert jnp.allclose(policy, ref_policy, atol=1e-4)
    assert jnp.allclose(critic, ref_critic, atol=1e-4)
    assert jnp.allclose(im, ref_im, atol=1e-4)

    print("KERNEL_OK")
</pallas_src>

<mosaic_0001>
module attributes {stable_mosaic.version = 11 : i64} {
  func.func @a2c_kernel(%arg0: memref<8x16xf32, #tpu.memory_space<vmem>>, %arg1: memref<16x128xf32, #tpu.memory_space<vmem>>, %arg2: memref<128x96xf32, #tpu.memory_space<vmem>>, %arg3: memref<96x128xf32, #tpu.memory_space<vmem>>, %arg4: memref<8x384xf32, #tpu.memory_space<vmem>>, %arg5: memref<8x128xf32, #tpu.memory_space<vmem>>) attributes {dimension_semantics = [], scalar_prefetch = 0 : i64, scratch_operands = 0 : i64, tpu.core_type = #tpu.core_type<tc>} {
    %c0 = arith.constant 0 : index
    %c0_0 = arith.constant 0 : index
    %0 = vector.load %arg0[%c0, %c0_0] : memref<8x16xf32, #tpu.memory_space<vmem>>, vector<8x16xf32>
    %c0_1 = arith.constant 0 : index
    %c0_2 = arith.constant 0 : index
    %1 = vector.load %arg1[%c0_1, %c0_2] : memref<16x128xf32, #tpu.memory_space<vmem>>, vector<16x128xf32>
    %cst = arith.constant dense<0.000000e+00> : vector<8x128xf32>
    %2 = tpu.matmul %0, %1, %cst {dimension_numbers = #tpu.dot_dimension_numbers<[1], [0], [0], [1], [0, 0, 1, 1], [], []>} : vector<8x16xf32>, vector<16x128xf32>, vector<8x128xf32> -> vector<8x128xf32>
    %c0_3 = arith.constant 0 : index
    %c0_4 = arith.constant 0 : index
    %3 = vector.load %arg4[%c0_3, %c0_4] : memref<8x384xf32, #tpu.memory_space<vmem>>, vector<8x128xf32>
    %4 = arith.addf %2, %3 : vector<8x128xf32>
    %cst_5 = arith.constant 0.000000e+00 : f32
    %5 = vector.broadcast %cst_5 : f32 to vector<8x128xf32>
    %6 = arith.maximumf %4, %5 : vector<8x128xf32>
    %c0_6 = arith.constant 0 : index
    %c0_7 = arith.constant 0 : index
    %7 = vector.load %arg2[%c0_6, %c0_7] : memref<128x96xf32, #tpu.memory_space<vmem>>, vector<128x96xf32>
    %cst_8 = arith.constant dense<0.000000e+00> : vector<8x96xf32>
    %8 = tpu.matmul %6, %7, %cst_8 {dimension_numbers = #tpu.dot_dimension_numbers<[1], [0], [0], [1], [0, 0, 1, 1], [], []>} : vector<8x128xf32>, vector<128x96xf32>, vector<8x96xf32> -> vector<8x96xf32>
    %c0_9 = arith.constant 0 : index
    %c128 = arith.constant 128 : index
    %9 = vector.load %arg4[%c0_9, %c128] : memref<8x384xf32, #tpu.memory_space<vmem>>, vector<8x96xf32>
    %10 = arith.addf %8, %9 : vector<8x96xf32>
    %cst_10 = arith.constant 0.000000e+00 : f32
    %11 = vector.broadcast %cst_10 : f32 to vector<8x96xf32>
    %12 = arith.maximumf %10, %11 : vector<8x96xf32>
    %c0_11 = arith.constant 0 : index
    %c0_12 = arith.constant 0 : index
    %13 = vector.load %arg3[%c0_11, %c0_12] : memref<96x128xf32, #tpu.memory_space<vmem>>, vector<96x128xf32>
    %cst_13 = arith.constant dense<0.000000e+00> : vector<8x128xf32>
    %14 = tpu.matmul %12, %13, %cst_13 {dimension_numbers = #tpu.dot_dimension_numbers<[1], [0], [0], [1], [0, 0, 1, 1], [], []>} : vector<8x96xf32>, vector<96x128xf32>, vector<8x128xf32> -> vector<8x128xf32>
    %c0_14 = arith.constant 0 : index
    %c256 = arith.constant 256 : index
    %15 = vector.load %arg4[%c0_14, %c256] : memref<8x384xf32, #tpu.memory_space<vmem>>, vector<8x128xf32>
    %16 = arith.addf %14, %15 : vector<8x128xf32>
    %c0_15 = arith.constant 0 : index
    %c0_16 = arith.constant 0 : index
    %17 = vector.load %arg5[%c0_15, %c0_16] : memref<8x128xf32, #tpu.memory_space<vmem>>, vector<8x128xf32>
    tpu.vector_store %arg5[%c0_15, %c0_16], %16 {strides = array<i32>} : memref<8x128xf32, #tpu.memory_space<vmem>>, vector<8x128xf32>,
    return
  }
}

</mosaic_0001>

<bundles_post_ra>
// kernel: tpu_custom_call.1
= control target key start
LH: loop header
LB: loop body
LE: loop exit
PB: predicated region body
PF: predicated region fallthrough
CT: control target
= control target key end

     0   :  { %vm25_vm0 = vcmask 130048   ;;  %s307_s0 = inlined_call_operand.vmem [shape: f32[8,16], index: 0, kind: input, shape index: {}]   ;;  %s308_s1 = inlined_call_operand.vmem [shape: f32[16,128], index: 1, kind: input, shape index: {}]   ;;  %s309_s2 = inlined_call_operand.vmem [shape: f32[128,96], index: 2, kind: input, shape index: {}]   ;;  %s310_s3 = inlined_call_operand.vmem [shape: f32[96,128], index: 3, kind: input, shape index: {}]   ;;  %s311_s4 = inlined_call_operand.vmem [shape: f32[8,384], index: 4, kind: input, shape index: {}]   ;;  %s312_s5 = inlined_call_operand.hbm [shape: f32[8,128], index: 5, kind: output, shape index: {}]  }
   0x1   :  { %v23_v0 = vld [vmem:[%s308_s1 + $0x8] sm:$0xff]  ;;  %v22_v1 = vld [vmem:[%s308_s1] sm:$0xff]  ;;  %v65_v3 = vld [vmem:[%s309_s2 + $0x78] sm:$0xff] }
   0x2   :  { %43 = vmatpush.msra.mxu0 %v23_v0  ;;  %v21_v2 = vld [vmem:[%s307_s0] sm:$0xff]  ;;  %v64_v4 = vld [vmem:[%s309_s2 + $0x70] sm:$0xff]  ;;  %67 = vmatpush.msra.mxu1 %v65_v3  ;;  %v63_v5 = vld [vmem:[%s309_s2 + $0x68] sm:$0xff] }
   0x3   :  { %v62_v6 = vld [vmem:[%s309_s2 + $0x60] sm:$0xff] }
   0x4   :  { %44 = vmatpush.msra.mxu0 %v22_v1  ;;  %68 = vmatpush.msra.mxu1 %v64_v4 }
   0x5   :  { %142 = vmatmul.msk.f32.vlgmr.msra.gmra.mxu0 %vm25_vm0, %v21_v2 }
   0x6   :  { %10 = vsyncpa [#allocation3], 0  ;;  %69 = vmatpush.msra.mxu1 %v63_v5  ;;  %v61_v7 = vld [vmem:[%s309_s2 + $0x58] sm:$0xff]  ;;  %v60_v8 = vld [vmem:[%s309_s2 + $0x50] sm:$0xff]  ;;  %vm101_vm1 = vcmask 785408   ;;  %s171_s30 = smov [#allocation2]  }
   0x7   :  { %v59_v9 = vld [vmem:[%s309_s2 + $0x48] sm:$0xff]  ;;  %v58_v10 = vld [vmem:[%s309_s2 + $0x40] sm:$0xff]  ;;  %v57_v11 = vld [vmem:[%s309_s2 + $0x38] sm:$0xff]  ;;  %s131_s0 = sshll.u32 %s171_s30, 4  ;;  %s132_s0 = int_to_ptr.vmem [resolvable:$true] %s131_s0 }
   0x8   :  { %70 = vmatpush.msra.mxu1 %v62_v6  ;;  %v56_v12 = vld [vmem:[%s309_s2 + $0x30] sm:$0xff]  ;;  %v55_v13 = vld [vmem:[%s309_s2 + $0x28] sm:$0xff]  ;;  %v54_v14 = vld [vmem:[%s309_s2 + $0x20] sm:$0xff] }
   0x9   :  { %v53_v15 = vld [vmem:[%s309_s2 + $0x18] sm:$0xff]  ;;  %v52_v16 = vld [vmem:[%s309_s2 + $0x10] sm:$0xff]  ;;  %v51_v17 = vld [vmem:[%s309_s2 + $0x8] sm:$0xff] }
   0xa   :  { %71 = vmatpush.msra.mxu1 %v61_v7  ;;  %v50_v18 = vld [vmem:[%s309_s2] sm:$0xff]  ;;  %v99_v19 = vld [vmem:[%s310_s3 + $0x58] sm:$0xff]  ;;  %v98_v20 = vld [vmem:[%s310_s3 + $0x50] sm:$0xff] }
   0xb   :  { %109 = vmatpush.msra.mxu2 %v99_v19  ;;  %v97_v21 = vld [vmem:[%s310_s3 + $0x48] sm:$0xff]  ;;  %v96_v22 = vld [vmem:[%s310_s3 + $0x40] sm:$0xff]  ;;  %v95_v23 = vld [vmem:[%s310_s3 + $0x38] sm:$0xff] }
   0xc   :  { %72 = vmatpush.msra.mxu1 %v60_v8  ;;  %v94_v24 = vld [vmem:[%s310_s3 + $0x30] sm:$0xff]  ;;  %v93_v25 = vld [vmem:[%s310_s3 + $0x28] sm:$0xff]  ;;  %v92_v26 = vld [vmem:[%s310_s3 + $0x20] sm:$0xff] }
   0xd   :  { %110 = vmatpush.msra.mxu2 %v98_v20  ;;  %v91_v27 = vld [vmem:[%s310_s3 + $0x18] sm:$0xff]  ;;  %v24_v28 = vld [vmem:[%s311_s4] sm:$0xff]  ;;  %v90_v32 = vld [vmem:[%s310_s3 + $0x10] sm:$0xff] }
   0xe   :  { %73 = vmatpush.msra.mxu1 %v59_v9  ;;  %v89_v33 = vld [vmem:[%s310_s3 + $0x8] sm:$0xff]  ;;  %v88_v34 = vld [vmem:[%s310_s3] sm:$0xff]  ;;  %v100_v39 = vld [vmem:[%s311_s4 + $0x10] sm:$0xff]  ;;  %s133_s3 = sshll.u32 %s312_s5, 4  ;;  %s134_s3 = int_to_ptr.hbm [resolvable:$true] %s133_s3 }
   0xf   :  { %111 = vmatpush.msra.mxu2 %v97_v21  ;;  %v66_v35 = vld [vmem:[%s311_s4 + $0x8] sm:$0xff] }
  0x10   :  { %74 = vmatpush.msra.mxu1 %v58_v10 }
  0x11   :  { %112 = vmatpush.msra.mxu2 %v96_v22 }
  0x12   :  { %75 = vmatpush.msra.mxu1 %v57_v11 }
  0x13   :  { %113 = vmatpush.msra.mxu2 %v95_v23 }
  0x14   :  { %76 = vmatpush.msra.mxu1 %v56_v12 }
  0x15   :  { %114 = vmatpush.msra.mxu2 %v94_v24 }
  0x16   :  { %77 = vmatpush.msra.mxu1 %v55_v13 }
  0x17   :  { %115 = vmatpush.msra.mxu2 %v93_v25 }
  0x18   :  { %78 = vmatpush.msra.mxu1 %v54_v14 }
  0x19   :  { %116 = vmatpush.msra.mxu2 %v92_v26 }
  0x1a   :  { %79 = vmatpush.msra.mxu1 %v53_v15 }
  0x1b   :  { %117 = vmatpush.msra.mxu2 %v91_v27 }
  0x1c   :  { %80 = vmatpush.msra.mxu1 %v52_v16 }
  0x1d   :  { %118 = vmatpush.msra.mxu2 %v90_v32 }
  0x1e   :  { %81 = vmatpush.msra.mxu1 %v51_v17 }
  0x1f   :  { %119 = vmatpush.msra.mxu2 %v89_v33 }
  0x20   :  { %82 = vmatpush.msra.mxu1 %v50_v18 }
  0x21   :  { %120 = vmatpush.msra.mxu2 %v88_v34 }
  0x82   :  { %v46_v29 = vpop.f32.mrf.mxu0 }
  0x83   :  { %v47_v30 = vadd.f32 %v46_v29, %v24_v28 }
  0x85   :  { %v49_v31 = vmax.f32 %v47_v30, 0.0 }
  0x87   :  { %83 = vmatmul.f32.vlgmr.msra.gmra.mxu1 %v49_v31 }
 0x104   :  { %v84_v36 = vpop.f32.mrf.mxu1 }
 0x105   :  { %v85_v37 = vadd.f32 %v84_v36, %v66_v35 }
 0x107   :  { %v87_v38 = vmax.f32 %v85_v37, 0.0 }
 0x109   :  { %143 = vmatmul.msk.f32.vlgmr.msra.gmra.mxu2 %vm101_vm1, %v87_v38 }
 0x18c   :  { %v122_v40 = vpop.f32.mrf.mxu2 }
 0x18d   :  { %v123_v41 = vadd.f32 %v122_v40, %v100_v39 }
 0x18f   :  { %125 = vst [vmem:[#allocation2] sm:$0xff] %v123_v41 }
 0x190   :  { %136 = dma.vmem_to_hbm [thread:$0]  %s132_s0, 128, %s134_s3, [#allocation3]  }
 0x191   :  { %169 = dma.done.wait [#allocation3], 128  }
 0x192   :  { %170 = vsyncadd [#allocation3], 4294967168 }
 0x193   :  { %141 = vsyncpa [#allocation3], 1 }

</bundles_post_ra>
